<compile_context>
chip_gen: v7x
topology: tpu7x:2x2x1
jax: 0.10.0
libtpu: 0.0.40
codegen_flags: <defaults>
</compile_context>

<pallas_src>
import functools

import jax
import jax.numpy as jnp
from jax import lax
from jax.experimental import pallas as pl
from jax.experimental.pallas import tpu as pltpu


def _attention_kernel(xq_ref, xf_ref, wq_ref, wk_ref, wv_ref, wout_ref, b_ref,
                      o_ref, *, heads, dim_head, tq, tk, scale, causal):
    """One (batch, q-tile) grid step.

    xq_ref   : (TQ, D)       query-tile rows of x (bf16)
    xf_ref   : (N,  D)       full sequence of x for this batch (bf16)
    wq_ref   : (H, D, Dh)    per-head Q weight (bf16)
    wk_ref   : (H, D, Dh)    per-head K weight (bf16)
    wv_ref   : (H, D, Dh)    per-head V weight (bf16)
    wout_ref : (H*Dh, D)     output projection weight (bf16)
    b_ref    : (1, D)        output bias (f32)
    o_ref    : (TQ, D)       output tile
    """
    qi = pl.program_id(1)
    xq = xq_ref[...]                                   # (TQ, D) bf16
    n_total = xf_ref.shape[0]

    neg_inf = float(-jnp.finfo(jnp.float32).max)
    # global row index of every score entry in this q-tile
    row_ids = qi * tq + lax.broadcasted_iota(jnp.int32, (tq, tk), 0)

    # number of KV tiles actually needed (causal: skip tiles above diagonal)
    n_kv = (qi + 1) if causal else (n_total // tk)

    outs = []
    for h in range(heads):                             # static, small H
        # Q projection for this head: MXU, bf16 inputs, f32 accumulate.
        q_h = (jnp.dot(xq, wq_ref[h], preferred_element_type=jnp.float32)
               * scale).astype(jnp.bfloat16)           # (TQ, Dh)

        def kv_body(j, carry, q_h=q_h, h=h):
            m_prev, l_prev, acc_prev = carry
            start = pl.multiple_of(j * tk, tk)
            x_j = xf_ref[pl.ds(start, tk), :]          # (TK, D) bf16
            k_j = jnp.dot(x_j, wk_ref[h],
                          preferred_element_type=jnp.float32).astype(jnp.bfloat16)
            v_j = jnp.dot(x_j, wv_ref[h],
                          preferred_element_type=jnp.float32).astype(jnp.bfloat16)

            # scores: contract last axes directly (no materialized transpose)
            s = lax.dot_general(q_h, k_j, (((1,), (1,)), ((), ())),
                                preferred_element_type=jnp.float32)  # (TQ, TK)
            if causal:
                col_ids = start + lax.broadcasted_iota(jnp.int32, (tq, tk), 1)
                s = jnp.where(col_ids > row_ids, neg_inf, s)

            # online softmax update (f32 running stats)
            m_cur = jnp.max(s, axis=-1, keepdims=True)
            m_new = jnp.maximum(m_prev, m_cur)
            alpha = jnp.exp(m_prev - m_new)
            p = jnp.exp(s - m_new)
            l_new = alpha * l_prev + jnp.sum(p, axis=-1, keepdims=True)
            acc_new = alpha * acc_prev + jnp.dot(
                p.astype(jnp.bfloat16), v_j, preferred_element_type=jnp.float32)
            return m_new, l_new, acc_new

        m0 = jnp.full((tq, 1), neg_inf, dtype=jnp.float32)
        l0 = jnp.zeros((tq, 1), dtype=jnp.float32)
        a0 = jnp.zeros((tq, dim_head), dtype=jnp.float32)
        _, l_f, acc_f = lax.fori_loop(0, n_kv, kv_body, (m0, l0, a0))

        # normalize with the (free) EUP approximate reciprocal
        outs.append(acc_f * pl.reciprocal(l_f, approx=True))   # (TQ, Dh) f32

    # Fused output projection: one matmul with contraction K = H*Dh.
    out_heads = jnp.concatenate(outs, axis=-1).astype(jnp.bfloat16)  # (TQ, inner)
    y = jnp.dot(out_heads, wout_ref[...], preferred_element_type=jnp.float32)
    y = y + b_ref[...]                                  # (1, D) broadcast bias
    o_ref[...] = y.astype(o_ref.dtype)


def attention_forward(x, w_qkv, w_out, b_out, *, heads, dim_head, causal=True):
    """x: (B, N, D); w_qkv: (3*H*Dh, D); w_out: (D, H*Dh); b_out: (D,)."""
    B, N, D = x.shape
    inner = heads * dim_head
    scale = dim_head ** (-0.5)

    # Query / KV tile size: whole sequence for short N, else 128-row tiles.
    tq = N if N <= 128 else 128
    assert N % tq == 0, "sequence length must be a multiple of the tile size"
    n_q_tiles = N // tq

    # Glue: bf16 MXU inputs, head-major weight layouts.
    x_bf16 = jnp.asarray(x).astype(jnp.bfloat16)
    w_qkv = jnp.asarray(w_qkv)
    wq = w_qkv[:inner].reshape(heads, dim_head, D).transpose(0, 2, 1).astype(jnp.bfloat16)
    wk = w_qkv[inner:2 * inner].reshape(heads, dim_head, D).transpose(0, 2, 1).astype(jnp.bfloat16)
    wv = w_qkv[2 * inner:].reshape(heads, dim_head, D).transpose(0, 2, 1).astype(jnp.bfloat16)
    wout_t = jnp.asarray(w_out).T.astype(jnp.bfloat16)           # (inner, D)
    bout = jnp.asarray(b_out).reshape(1, D).astype(jnp.float32)

    kernel = functools.partial(
        _attention_kernel, heads=heads, dim_head=dim_head,
        tq=tq, tk=tq, scale=scale, causal=causal)

    flops = (2 * B * N * D * 3 * inner          # QKV projections
             + 4 * B * heads * N * N * dim_head  # scores + attn@v
             + 2 * B * N * inner * D)            # output projection
    bytes_accessed = int(2 * B * N * D * 2       # x read as two bf16 inputs
                         + (3 * inner * D + inner * D) * 2  # bf16 weights
                         + D * 4                 # bias
                         + B * N * D * 4)        # f32 output
    cost = pl.CostEstimate(flops=int(flops),
                           transcendentals=int(B * heads * N * N),
                           bytes_accessed=bytes_accessed)

    # TODO(synk): for very long sequences, precompute K/V once per batch
    # (avoids the per-q-tile re-projection inherent to this fully fused form).
    return pl.pallas_call(
        kernel,
        out_shape=jax.ShapeDtypeStruct((B, N, D), x.dtype),
        grid_spec=pltpu.PrefetchScalarGridSpec(
            num_scalar_prefetch=0,
            grid=(B, n_q_tiles),
            in_specs=[
                pl.BlockSpec((None, tq, D), lambda b, qi: (b, qi, 0)),   # x (q tile)
                pl.BlockSpec((None, N, D), lambda b, qi: (b, 0, 0)),     # x (full, for K/V)
                pl.BlockSpec((heads, D, dim_head), lambda b, qi: (0, 0, 0)),
                pl.BlockSpec((heads, D, dim_head), lambda b, qi: (0, 0, 0)),
                pl.BlockSpec((heads, D, dim_head), lambda b, qi: (0, 0, 0)),
                pl.BlockSpec((inner, D), lambda b, qi: (0, 0)),
                pl.BlockSpec((1, D), lambda b, qi: (0, 0)),
            ],
            out_specs=pl.BlockSpec((None, tq, D), lambda b, qi: (b, qi, 0)),
        ),
        compiler_params=pltpu.CompilerParams(
            dimension_semantics=("parallel", "parallel")),
        cost_estimate=cost,
    )(x_bf16, x_bf16, wq, wk, wv, wout_t, bout)


def attention_reference(x, w_qkv, w_out, b_out, *, heads, dim_head, causal=True):
    """Plain-JAX f32 reference mirroring the PyTorch forward exactly."""
    B, N, D = x.shape
    inner = heads * dim_head
    scale = dim_head ** (-0.5)

    qkv = x @ w_qkv.T
    q, k, v = jnp.split(qkv, 3, axis=-1)

    def split_heads(t):  # b n (h d) -> b h n d
        return t.reshape(B, N, heads, dim_head).transpose(0, 2, 1, 3)

    q, k, v = map(split_heads, (q, k, v))
    q = q * scale
    dots = jnp.einsum('bhid,bhjd->bhij', q, k)
    if causal:
        mask = jnp.triu(jnp.ones((N, N), dtype=bool), k=1)
        dots = jnp.where(mask, -jnp.finfo(dots.dtype).max, dots)
    attn = jax.nn.softmax(dots, axis=-1)
    out = jnp.einsum('bhij,bhjd->bhid', attn, v)
    out = out.transpose(0, 2, 1, 3).reshape(B, N, inner)
    return out @ w_out.T + b_out


if __name__ == "__main__":
    # Small shapes consistent with the module's forward.
    B, N, D = 2, 8, 32
    heads, dim_head = 2, 16
    inner = heads * dim_head

    key = jax.random.PRNGKey(0)
    kx, kq, kw, kb = jax.random.split(key, 4)

    x = jax.random.normal(kx, (B, N, D), dtype=jnp.float32)
    w_qkv = jax.random.normal(kq, (3 * inner, D), dtype=jnp.float32) * 0.05
    w_out = jax.random.normal(kw, (D, inner), dtype=jnp.float32) * 0.05
    b_out = jax.random.normal(kb, (D,), dtype=jnp.float32) * 0.05

    out = attention_forward(x, w_qkv, w_out, b_out,
                            heads=heads, dim_head=dim_head, causal=True)
    out = jax.block_until_ready(out)

    ref = attention_reference(x, w_qkv, w_out, b_out,
                              heads=heads, dim_head=dim_head, causal=True)

    assert out.shape == (B, N, D)
    # bf16 MXU inputs + approx reciprocal: loosen tolerance vs the f32 reference.
    assert jnp.allclose(out, ref, atol=3e-2, rtol=3e-2), "mismatch vs reference"
    print("KERNEL_OK")
</pallas_src>

<mosaic_0001>
module attributes {stable_mosaic.version = 11 : i64} {
  func.func @_attention_kernel(%arg0: i32, %arg1: i32, %arg2: memref<1x8x32xbf16, #tpu.memory_space<vmem>>, %arg3: memref<1x8x32xbf16, #tpu.memory_space<vmem>>, %arg4: memref<2x32x16xbf16, #tpu.memory_space<vmem>>, %arg5: memref<2x32x16xbf16, #tpu.memory_space<vmem>>, %arg6: memref<2x32x16xbf16, #tpu.memory_space<vmem>>, %arg7: memref<32x32xbf16, #tpu.memory_space<vmem>>, %arg8: memref<1x32xf32, #tpu.memory_space<vmem>>, %arg9: memref<1x8x32xf32, #tpu.memory_space<vmem>>) attributes {dimension_semantics = [#tpu.dimension_semantics<parallel>, #tpu.dimension_semantics<parallel>], iteration_bounds = array<i64: 2, 1>, scalar_prefetch = 0 : i64, scratch_operands = 0 : i64, tpu.core_type = #tpu.core_type<tc>, window_params = [{transform_indices = @transform_0, window_bounds = array<i64: 1, 8, 32>}, {transform_indices = @transform_1, window_bounds = array<i64: 1, 8, 32>}, {pipeline_mode = #tpu.pipeline_mode<synchronous>, transform_indices = @transform_2, window_bounds = array<i64: 2, 32, 16>}, {pipeline_mode = #tpu.pipeline_mode<synchronous>, transform_indices = @transform_3, window_bounds = array<i64: 2, 32, 16>}, {pipeline_mode = #tpu.pipeline_mode<synchronous>, transform_indices = @transform_4, window_bounds = array<i64: 2, 32, 16>}, {pipeline_mode = #tpu.pipeline_mode<synchronous>, transform_indices = @transform_5, window_bounds = array<i64: 32, 32>}, {pipeline_mode = #tpu.pipeline_mode<synchronous>, transform_indices = @transform_6, window_bounds = array<i64: 1, 32>}, {transform_indices = @transform_7, window_bounds = array<i64: 1, 8, 32>}]} {
    %c0 = arith.constant 0 : index
    %c0_0 = arith.constant 0 : index
    %c0_1 = arith.constant 0 : index
    %0 = vector.load %arg2[%c0, %c0_0, %c0_1] : memref<1x8x32xbf16, #tpu.memory_space<vmem>>, vector<1x8x32xbf16>
    %1 = vector.shape_cast %0 : vector<1x8x32xbf16> to vector<8x32xbf16>
    %c8_i32 = arith.constant 8 : i32
    %2 = arith.muli %arg1, %c8_i32 : i32
    %3 = tpu.iota {dimensions = array<i32: 0>} : vector<8x8xi32>
    %4 = vector.broadcast %2 : i32 to vector<8x8xi32>
    %5 = arith.addi %4, %3 : vector<8x8xi32>
    %c1_i32 = arith.constant 1 : i32
    %6 = arith.addi %arg1, %c1_i32 : i32
    %c0_2 = arith.constant 0 : index
    %c0_3 = arith.constant 0 : index
    %c0_4 = arith.constant 0 : index
    %7 = vector.load %arg4[%c0_2, %c0_3, %c0_4] : memref<2x32x16xbf16, #tpu.memory_space<vmem>>, vector<1x32x16xbf16>
    %8 = vector.shape_cast %7 : vector<1x32x16xbf16> to vector<32x16xbf16>
    %cst = arith.constant dense<0.000000e+00> : vector<8x16xf32>
    %9 = tpu.matmul %1, %8, %cst {dimension_numbers = #tpu.dot_dimension_numbers<[1], [0], [0], [1], [0, 0, 1, 1], [], []>} : vector<8x32xbf16>, vector<32x16xbf16>, vector<8x16xf32> -> vector<8x16xf32>
    %cst_5 = arith.constant 2.500000e-01 : f32
    %10 = vector.broadcast %cst_5 : f32 to vector<8x16xf32>
    %11 = arith.mulf %9, %10 : vector<8x16xf32>
    %12 = arith.truncf %11 : vector<8x16xf32> to vector<8x16xbf16>
    %cst_6 = arith.constant -3.40282347E+38 : f32
    %13 = vector.broadcast %cst_6 : f32 to vector<8x1xf32>
    %cst_7 = arith.constant 0.000000e+00 : f32
    %14 = vector.broadcast %cst_7 : f32 to vector<8x1xf32>
    %cst_8 = arith.constant 0.000000e+00 : f32
    %15 = vector.broadcast %cst_8 : f32 to vector<8x16xf32>
    %c0_i32 = arith.constant 0 : i32
    %16 = arith.subi %6, %c0_i32 : i32
    %17 = arith.addi %c0_i32, %16 : i32
    %c1_i32_9 = arith.constant 1 : i32
    %18:3 = scf.for %arg10 = %c0_i32 to %17 step %c1_i32_9 iter_args(%arg11 = %13, %arg12 = %14, %arg13 = %15) -> (vector<8x1xf32>, vector<8x1xf32>, vector<8x16xf32>)  : i32 {
      %c8_i32_27 = arith.constant 8 : i32
      %47 = arith.muli %arg10, %c8_i32_27 : i32
      %48 = tpu.assume_multiple %47, 8 : i32
      %c0_28 = arith.constant 0 : index
      %49 = arith.index_cast %48 : i32 to index
      %c0_29 = arith.constant 0 : index
      %50 = vector.load %arg3[%c0_28, %49, %c0_29] : memref<1x8x32xbf16, #tpu.memory_space<vmem>>, vector<1x8x32xbf16>
      %51 = vector.shape_cast %50 : vector<1x8x32xbf16> to vector<8x32xbf16>
      %c0_30 = arith.constant 0 : index
      %c0_31 = arith.constant 0 : index
      %c0_32 = arith.constant 0 : index
      %52 = vector.load %arg5[%c0_30, %c0_31, %c0_32] : memref<2x32x16xbf16, #tpu.memory_space<vmem>>, vector<1x32x16xbf16>
      %53 = vector.shape_cast %52 : vector<1x32x16xbf16> to vector<32x16xbf16>
      %cst_33 = arith.constant dense<0.000000e+00> : vector<8x16xf32>
      %54 = tpu.matmul %51, %53, %cst_33 {dimension_numbers = #tpu.dot_dimension_numbers<[1], [0], [0], [1], [0, 0, 1, 1], [], []>} : vector<8x32xbf16>, vector<32x16xbf16>, vector<8x16xf32> -> vector<8x16xf32>
      %55 = arith.truncf %54 : vector<8x16xf32> to vector<8x16xbf16>
      %c0_34 = arith.constant 0 : index
      %c0_35 = arith.constant 0 : index
      %c0_36 = arith.constant 0 : index
      %56 = vector.load %arg6[%c0_34, %c0_35, %c0_36] : memref<2x32x16xbf16, #tpu.memory_space<vmem>>, vector<1x32x16xbf16>
      %57 = vector.shape_cast %56 : vector<1x32x16xbf16> to vector<32x16xbf16>
      %cst_37 = arith.constant dense<0.000000e+00> : vector<8x16xf32>
      %58 = tpu.matmul %51, %57, %cst_37 {dimension_numbers = #tpu.dot_dimension_numbers<[1], [0], [0], [1], [0, 0, 1, 1], [], []>} : vector<8x32xbf16>, vector<32x16xbf16>, vector<8x16xf32> -> vector<8x16xf32>
      %59 = arith.truncf %58 : vector<8x16xf32> to vector<8x16xbf16>
      %cst_38 = arith.constant dense<0.000000e+00> : vector<8x8xf32>
      %60 = tpu.matmul %12, %55, %cst_38 {dimension_numbers = #tpu.dot_dimension_numbers<[1], [1], [0], [0], [0, 0, 1, 0], [], []>} : vector<8x16xbf16>, vector<8x16xbf16>, vector<8x8xf32> -> vector<8x8xf32>
      %61 = tpu.iota {dimensions = array<i32: 1>} : vector<8x8xi32>
      %62 = vector.broadcast %48 : i32 to vector<8x8xi32>
      %63 = arith.addi %62, %61 : vector<8x8xi32>
      %64 = arith.cmpi sgt, %63, %5 : vector<8x8xi32>
      %cst_39 = arith.constant -3.40282347E+38 : f32
      %65 = vector.broadcast %cst_39 : f32 to vector<8x8xf32>
      %66 = arith.select %64, %65, %60 : vector<8x8xi1>, vector<8x8xf32>
      %cst_40 = arith.constant dense<0xFF800000> : vector<8xf32>
      %67 = vector.multi_reduction <maximumf>, %66, %cst_40 [1] : vector<8x8xf32> to vector<8xf32>
      %68 = vector.shape_cast %67 : vector<8xf32> to vector<8x1xf32>
      %69 = arith.maximumf %arg11, %68 : vector<8x1xf32>
      %70 = arith.subf %arg11, %69 : vector<8x1xf32>
      %71 = math.exp %70 : vector<8x1xf32>
      %72 = vector.broadcast %69 : vector<8x1xf32> to vector<8x8xf32>
      %73 = arith.subf %66, %72 : vector<8x8xf32>
      %74 = math.exp %73 : vector<8x8xf32>
      %75 = arith.mulf %71, %arg12 : vector<8x1xf32>
      %cst_41 = arith.constant dense<0.000000e+00> : vector<8xf32>
      %76 = vector.multi_reduction <add>, %74, %cst_41 [1] : vector<8x8xf32> to vector<8xf32>
      %77 = vector.shape_cast %76 : vector<8xf32> to vector<8x1xf32>
      %78 = arith.addf %75, %77 : vector<8x1xf32>
      %79 = vector.broadcast %71 : vector<8x1xf32> to vector<8x16xf32>
      %80 = arith.mulf %79, %arg13 : vector<8x16xf32>
      %81 = arith.truncf %74 : vector<8x8xf32> to vector<8x8xbf16>
      %cst_42 = arith.constant dense<0.000000e+00> : vector<8x16xf32>
      %82 = tpu.matmul %81, %59, %cst_42 {dimension_numbers = #tpu.dot_dimension_numbers<[1], [0], [0], [1], [0, 0, 1, 1], [], []>} : vector<8x8xbf16>, vector<8x16xbf16>, vector<8x16xf32> -> vector<8x16xf32>
      %83 = arith.addf %80, %82 : vector<8x16xf32>
      scf.yield %69, %78, %83 : vector<8x1xf32>, vector<8x1xf32>, vector<8x16xf32>
    }
    %19 = tpu.reciprocal %18#1 {approx = true} : vector<8x1xf32> -> vector<8x1xf32>
    %20 = vector.broadcast %19 : vector<8x1xf32> to vector<8x16xf32>
    %21 = arith.mulf %18#2, %20 : vector<8x16xf32>
    %c1 = arith.constant 1 : index
    %c0_10 = arith.constant 0 : index
    %c0_11 = arith.constant 0 : index
    %22 = vector.load %arg4[%c1, %c0_10, %c0_11] : memref<2x32x16xbf16, #tpu.memory_space<vmem>>, vector<1x32x16xbf16>
    %23 = vector.shape_cast %22 : vector<1x32x16xbf16> to vector<32x16xbf16>
    %cst_12 = arith.constant dense<0.000000e+00> : vector<8x16xf32>
    %24 = tpu.matmul %1, %23, %cst_12 {dimension_numbers = #tpu.dot_dimension_numbers<[1], [0], [0], [1], [0, 0, 1, 1], [], []>} : vector<8x32xbf16>, vector<32x16xbf16>, vector<8x16xf32> -> vector<8x16xf32>
    %cst_13 = arith.constant 2.500000e-01 : f32
    %25 = vector.broadcast %cst_13 : f32 to vector<8x16xf32>
    %26 = arith.mulf %24, %25 : vector<8x16xf32>
    %27 = arith.truncf %26 : vector<8x16xf32> to vector<8x16xbf16>
    %cst_14 = arith.constant -3.40282347E+38 : f32
    %28 = vector.broadcast %cst_14 : f32 to vector<8x1xf32>
    %cst_15 = arith.constant 0.000000e+00 : f32
    %29 = vector.broadcast %cst_15 : f32 to vector<8x1xf32>
    %cst_16 = arith.constant 0.000000e+00 : f32
    %30 = vector.broadcast %cst_16 : f32 to vector<8x16xf32>
    %c0_i32_17 = arith.constant 0 : i32
    %31 = arith.subi %6, %c0_i32_17 : i32
    %32 = arith.addi %c0_i32_17, %31 : i32
    %c1_i32_18 = arith.constant 1 : i32
    %33:3 = scf.for %arg10 = %c0_i32_17 to %32 step %c1_i32_18 iter_args(%arg11 = %28, %arg12 = %29, %arg13 = %30) -> (vector<8x1xf32>, vector<8x1xf32>, vector<8x16xf32>)  : i32 {
      %c8_i32_27 = arith.constant 8 : i32
      %47 = arith.muli %arg10, %c8_i32_27 : i32
      %48 = tpu.assume_multiple %47, 8 : i32
      %c0_28 = arith.constant 0 : index
      %49 = arith.index_cast %48 : i32 to index
      %c0_29 = arith.constant 0 : index
      %50 = vector.load %arg3[%c0_28, %49, %c0_29] : memref<1x8x32xbf16, #tpu.memory_space<vmem>>, vector<1x8x32xbf16>
      %51 = vector.shape_cast %50 : vector<1x8x32xbf16> to vector<8x32xbf16>
      %c1_30 = arith.constant 1 : index
      %c0_31 = arith.constant 0 : index
      %c0_32 = arith.constant 0 : index
      %52 = vector.load %arg5[%c1_30, %c0_31, %c0_32] : memref<2x32x16xbf16, #tpu.memory_space<vmem>>, vector<1x32x16xbf16>
      %53 = vector.shape_cast %52 : vector<1x32x16xbf16> to vector<32x16xbf16>
      %cst_33 = arith.constant dense<0.000000e+00> : vector<8x16xf32>
      %54 = tpu.matmul %51, %53, %cst_33 {dimension_numbers = #tpu.dot_dimension_numbers<[1], [0], [0], [1], [0, 0, 1, 1], [], []>} : vector<8x32xbf16>, vector<32x16xbf16>, vector<8x16xf32> -> vector<8x16xf32>
      %55 = arith.truncf %54 : vector<8x16xf32> to vector<8x16xbf16>
      %c1_34 = arith.constant 1 : index
      %c0_35 = arith.constant 0 : index
      %c0_36 = arith.constant 0 : index
      %56 = vector.load %arg6[%c1_34, %c0_35, %c0_36] : memref<2x32x16xbf16, #tpu.memory_space<vmem>>, vector<1x32x16xbf16>
      %57 = vector.shape_cast %56 : vector<1x32x16xbf16> to vector<32x16xbf16>
      %cst_37 = arith.constant dense<0.000000e+00> : vector<8x16xf32>
      %58 = tpu.matmul %51, %57, %cst_37 {dimension_numbers = #tpu.dot_dimension_numbers<[1], [0], [0], [1], [0, 0, 1, 1], [], []>} : vector<8x32xbf16>, vector<32x16xbf16>, vector<8x16xf32> -> vector<8x16xf32>
      %59 = arith.truncf %58 : vector<8x16xf32> to vector<8x16xbf16>
      %cst_38 = arith.constant dense<0.000000e+00> : vector<8x8xf32>
      %60 = tpu.matmul %27, %55, %cst_38 {dimension_numbers = #tpu.dot_dimension_numbers<[1], [1], [0], [0], [0, 0, 1, 0], [], []>} : vector<8x16xbf16>, vector<8x16xbf16>, vector<8x8xf32> -> vector<8x8xf32>
      %61 = tpu.iota {dimensions = array<i32: 1>} : vector<8x8xi32>
      %62 = vector.broadcast %48 : i32 to vector<8x8xi32>
      %63 = arith.addi %62, %61 : vector<8x8xi32>
      %64 = arith.cmpi sgt, %63, %5 : vector<8x8xi32>
      %cst_39 = arith.constant -3.40282347E+38 : f32
      %65 = vector.broadcast %cst_39 : f32 to vector<8x8xf32>
      %66 = arith.select %64, %65, %60 : vector<8x8xi1>, vector<8x8xf32>
      %cst_40 = arith.constant dense<0xFF800000> : vector<8xf32>
      %67 = vector.multi_reduction <maximumf>, %66, %cst_40 [1] : vector<8x8xf32> to vector<8xf32>
      %68 = vector.shape_cast %67 : vector<8xf32> to vector<8x1xf32>
      %69 = arith.maximumf %arg11, %68 : vector<8x1xf32>
      %70 = arith.subf %arg11, %69 : vector<8x1xf32>
      %71 = math.exp %70 : vector<8x1xf32>
      %72 = vector.broadcast %69 : vector<8x1xf32> to vector<8x8xf32>
      %73 = arith.subf %66, %72 : vector<8x8xf32>
      %74 = math.exp %73 : vector<8x8xf32>
      %75 = arith.mulf %71, %arg12 : vector<8x1xf32>
      %cst_41 = arith.constant dense<0.000000e+00> : vector<8xf32>
      %76 = vector.multi_reduction <add>, %74, %cst_41 [1] : vector<8x8xf32> to vector<8xf32>
      %77 = vector.shape_cast %76 : vector<8xf32> to vector<8x1xf32>
      %78 = arith.addf %75, %77 : vector<8x1xf32>
      %79 = vector.broadcast %71 : vector<8x1xf32> to vector<8x16xf32>
      %80 = arith.mulf %79, %arg13 : vector<8x16xf32>
      %81 = arith.truncf %74 : vector<8x8xf32> to vector<8x8xbf16>
      %cst_42 = arith.constant dense<0.000000e+00> : vector<8x16xf32>
      %82 = tpu.matmul %81, %59, %cst_42 {dimension_numbers = #tpu.dot_dimension_numbers<[1], [0], [0], [1], [0, 0, 1, 1], [], []>} : vector<8x8xbf16>, vector<8x16xbf16>, vector<8x16xf32> -> vector<8x16xf32>
      %83 = arith.addf %80, %82 : vector<8x16xf32>
      scf.yield %69, %78, %83 : vector<8x1xf32>, vector<8x1xf32>, vector<8x16xf32>
    }
    %34 = tpu.reciprocal %33#1 {approx = true} : vector<8x1xf32> -> vector<8x1xf32>
    %35 = vector.broadcast %34 : vector<8x1xf32> to vector<8x16xf32>
    %36 = arith.mulf %33#2, %35 : vector<8x16xf32>
    %37 = tpu.concatenate %21, %36 in 1 : vector<8x16xf32>, vector<8x16xf32> -> vector<8x32xf32>
    %38 = arith.truncf %37 : vector<8x32xf32> to vector<8x32xbf16>
    %c0_19 = arith.constant 0 : index
    %c0_20 = arith.constant 0 : index
    %39 = vector.load %arg7[%c0_19, %c0_20] : memref<32x32xbf16, #tpu.memory_space<vmem>>, vector<32x32xbf16>
    %cst_21 = arith.constant dense<0.000000e+00> : vector<8x32xf32>
    %40 = tpu.matmul %38, %39, %cst_21 {dimension_numbers = #tpu.dot_dimension_numbers<[1], [0], [0], [1], [0, 0, 1, 1], [], []>} : vector<8x32xbf16>, vector<32x32xbf16>, vector<8x32xf32> -> vector<8x32xf32>
    %c0_22 = arith.constant 0 : index
    %c0_23 = arith.constant 0 : index
    %41 = vector.load %arg8[%c0_22, %c0_23] : memref<1x32xf32, #tpu.memory_space<vmem>>, vector<1x32xf32>
    %42 = vector.broadcast %41 : vector<1x32xf32> to vector<8x32xf32>
    %43 = arith.addf %40, %42 : vector<8x32xf32>
    %c0_24 = arith.constant 0 : index
    %c0_25 = arith.constant 0 : index
    %c0_26 = arith.constant 0 : index
    %44 = vector.load %arg9[%c0_24, %c0_25, %c0_26] : memref<1x8x32xf32, #tpu.memory_space<vmem>>, vector<1x8x32xf32>
    %45 = vector.shape_cast %44 : vector<1x8x32xf32> to vector<8x32xf32>
    %46 = vector.shape_cast %43 : vector<8x32xf32> to vector<1x8x32xf32>
    tpu.vector_store %arg9[%c0_24, %c0_25, %c0_26], %46 {strides = array<i32>} : memref<1x8x32xf32, #tpu.memory_space<vmem>>, vector<1x8x32xf32>,
    return
  }
  func.func @transform_0(%arg0: i32, %arg1: i32) -> (i32, i32, i32) {
    %c0_i32 = arith.constant 0 : i32
    %c0_i32_0 = arith.constant 0 : i32
    return %arg0, %arg1, %c0_i32 : i32, i32, i32
  }
  func.func @transform_1(%arg0: i32, %arg1: i32) -> (i32, i32, i32) {
    %c0_i32 = arith.constant 0 : i32
    %c0_i32_0 = arith.constant 0 : i32
    %c0_i32_1 = arith.constant 0 : i32
    return %arg0, %c0_i32, %c0_i32_0 : i32, i32, i32
  }
  func.func @transform_2(%arg0: i32, %arg1: i32) -> (i32, i32, i32) {
    %c0_i32 = arith.constant 0 : i32
    %c0_i32_0 = arith.constant 0 : i32
    %c0_i32_1 = arith.constant 0 : i32
    %c0_i32_2 = arith.constant 0 : i32
    return %c0_i32, %c0_i32_0, %c0_i32_1 : i32, i32, i32
  }
  func.func @transform_3(%arg0: i32, %arg1: i32) -> (i32, i32, i32) {
    %c0_i32 = arith.constant 0 : i32
    %c0_i32_0 = arith.constant 0 : i32
    %c0_i32_1 = arith.constant 0 : i32
    %c0_i32_2 = arith.constant 0 : i32
    return %c0_i32, %c0_i32_0, %c0_i32_1 : i32, i32, i32
  }
  func.func @transform_4(%arg0: i32, %arg1: i32) -> (i32, i32, i32) {
    %c0_i32 = arith.constant 0 : i32
    %c0_i32_0 = arith.constant 0 : i32
    %c0_i32_1 = arith.constant 0 : i32
    %c0_i32_2 = arith.constant 0 : i32
    return %c0_i32, %c0_i32_0, %c0_i32_1 : i32, i32, i32
  }
  func.func @transform_5(%arg0: i32, %arg1: i32) -> (i32, i32) {
    %c0_i32 = arith.constant 0 : i32
    %c0_i32_0 = arith.constant 0 : i32
    %c0_i32_1 = arith.constant 0 : i32
    return %c0_i32, %c0_i32_0 : i32, i32
  }
  func.func @transform_6(%arg0: i32, %arg1: i32) -> (i32, i32) {
    %c0_i32 = arith.constant 0 : i32
    %c0_i32_0 = arith.constant 0 : i32
    %c0_i32_1 = arith.constant 0 : i32
    return %c0_i32, %c0_i32_0 : i32, i32
  }
  func.func @transform_7(%arg0: i32, %arg1: i32) -> (i32, i32, i32) {
    %c0_i32 = arith.constant 0 : i32
    %c0_i32_0 = arith.constant 0 : i32
    return %arg0, %arg1, %c0_i32 : i32, i32, i32
  }
}

</mosaic_0001>

<bundles_post_ra>
// kernel: tpu_custom_call.1
= control target key start
LH: loop header
LB: loop body
LE: loop exit
PB: predicated region body
PF: predicated region fallthrough
CT: control target
= control target key end

     0   :  { %12 = vsyncpa [#allocation3], 0  ;;  %s1979_s0 = inlined_call_operand.vmem [shape: bf16[2,8,32], index: 0, kind: input, shape index: {}]   ;;  %s1980_s1 = inlined_call_operand.vmem [shape: bf16[2,8,32], index: 1, kind: input, shape index: {}]   ;;  %s1981_s2 = inlined_call_operand.vmem [shape: bf16[2,32,16], index: 2, kind: input, shape index: {}]   ;;  %s1982_s3 = inlined_call_operand.vmem [shape: bf16[2,32,16], index: 3, kind: input, shape index: {}]   ;;  %s1983_s4 = inlined_call_operand.vmem [shape: bf16[2,32,16], index: 4, kind: input, shape index: {}]   ;;  %s1984_s5 = inlined_call_operand.vmem [shape: bf16[32,32], index: 5, kind: input, shape index: {}]   ;;  %s1985_s6 = inlined_call_operand.vmem [shape: f32[1,32], index: 6, kind: input, shape index: {}]   ;;  %s1986_s7 = inlined_call_operand.hbm [shape: f32[2,8,32], index: 7, kind: output, shape index: {}]  }
   0x1   :  { %14 = vsyncpa [#allocation3 + $0x1], 0  ;;  %s1664_s24 = smov 0   ;;  %s1666_s25 = smov 0  }
   0x2   :  { %s1668_s26 = smov 0   ;;  %s1670_s27 = smov 0  }
   0x3   :  { %s1672_s28 = smov 0   ;;  %s1674_s29 = smov 0  }
   0x4 LB: > { %s1157_s30 = sadd.s32 4294967295, %s1582_s29   ;;  %s1158_s8 = sadd.s32 4294967294, %s1582_s29   ;;  %s1582_s29 = sphi %s1674_s29, %s20_s29   ;;  %s1578_s28 = sphi %s1672_s28, %s1999_s28   ;;  %s1574_s27 = sphi %s1670_s27, %s1998_s27   ;;  %s1570_s26 = sphi %s1668_s26, %s1997_s26   ;;  %s1566_s25 = sphi %s1666_s25, %s1996_s25   ;;  %s1562_s24 = sphi %s1664_s24, %s1995_s24  }
   0x5   : > { %s32_s9 = sadd.s32 1, %s1578_s28  ;;  %s200_s10 = sadd.s32 1, %s1570_s26 }
   0x6   : > { %p34_p0 = scmp.ge.s32.totalorder %s32_s9, 2  ;;  %p210_p1 = scmp.ne.s32.totalorder %s1570_s26, %s1566_s25 }
   0x7   : > { %p211_p2 = scmp.eq.s32.totalorder %s1157_s30, 1  ;;  %p216_p3 = scmp.ne.s32.totalorder %s1566_s25, %s1562_s24 }
   0x8   : > { %s2001_s9 = smov (%p34_p0, %s32_s9), 0  ;;  %p217_p5 = scmp.eq.s32.totalorder %s1158_s8, 1 }
   0x9   : > { %p1704_p4 = por %p211_p2, %p210_p1  ;;  %s195_s12 = ssub.s32 %s1578_s28, %s2001_s9 }
   0xa   : > { %p1161_p6 = scmp.ge.s32.totalorder %s1582_s29, 1  ;;  %p198_p7 = scmp.eq.s32.totalorder %s195_s12, 0 }
   0xb   : > { %p1711_p8 = por %p217_p5, %p216_p3  ;;  %p267_p9 = scmp.lt.s32.totalorder %s1582_s29, 3 }
   0xc   : > { %s1717_s14 = scalar_select %p198_p7, %s1570_s26, %s200_s10  }
   0xd   : > { %p268_p10 = pnand %p1161_p6, %p267_p9 }
   0xe   : > { %s302_s15 = sand.u32 (!%p268_p10), 1, %s1566_s25   ;;  %v319_v0 = vlaneseq (!%p268_p10)  ;;  %v1616_v1 = vmov (!%p268_p10), 0.0   ;;  %v1446_v2 = vld [vmem:[%s1981_s2] sm:$0xff] (!%p268_p10)   ;;  %p305_p11 = scmp.lt.s32.totalorder (!%p268_p10), %s1574_s27, 1  ;;  %v1447_v4 = vld [vmem:[%s1981_s2 + $0x8] sm:$0xff] (!%p268_p10)   ;;  %vm1617_vm0 = vmmov (!%p268_p10), 0  }
   0xf   : > { %271 = sbr.rel (%p268_p10) target bundleno = 2232 (0x8b8), region = 48  ;;  %s1722_s16 = sshll.u32 (!%p268_p10), %s302_s15, 3  ;;  %1240 = vmatprep.subr.bf16.mxu0 (!%p268_p10), %v1616_v1  ;;  %1244 = vmatprep.mubr.msk.bf16.mxu0 (!%p268_p10), %vm1617_vm0, %v1616_v1  ;;  %vm340_vm1 = vcmask (!%p268_p10), 261120   ;;  %v1756_v12 = vmov (!%p268_p10), 0.0   ;;  %v1758_v13 = vmov (!%p268_p10), 0.0  }
  0x10   : > { %v1729_v3 = vshrl.u32 (!%p268_p10), %v319_v0, 7  ;;  %1241 = vmatpush3.bf16.msra.mxu0 (!%p268_p10), %v1446_v2  ;;  %s304_s18 = scalar_lea.vmem (!%p268_p10), [#allocation2], %s1722_s16  ;;  %v1760_v14 = vmov (!%p268_p10), -3.4028235e+38   ;;  %s1762_s19 = smov (!%p268_p10), 0  }
  0x11   : > { %1242 = vmatprep.subr.bf16.mxu0 (!%p268_p10), %v1616_v1 }
  0x14   : > { %1243 = vmatpush3.bf16.msra.mxu0 (!%p268_p10), %v1447_v4 }
  0x16   : > { %s306_s21 = scalar_select %p305_p11, %s1574_s27, 1 }
  0x18   : > { %s1163_s22 = sshll.u32 %s306_s21, 2 }
  0x19   : > { %s311_s8 = scalar_lea.vmem %s1979_s0, %s1163_s22  ;;  %s1745_s17 = scalar_lea.vmem %s1980_s1, %s1163_s22 }
  0x1a   : > { %v1747_v5 = vld [vmem:[%s311_s8] sm:$0xf] }
  0x1b   : > { %1245 = vmatmul.mubr.msk.bf16.vlgmr.msra.gmra.mrb[0].mxu0 %vm340_vm1, %v1747_v5 }
  0xee   : > { %v378_v6 = vpop.f32.mrb[0].mxu0 }
  0xef   : > { %v1751_v7 = vmul.f32 0.25, %v378_v6  ;;  %v1246_v8 = vpop.f32.mrb[1].mxu0 }
  0xf0   : > { %v381_v9 = vpop.f32.mrb[2].mxu0 }
  0xf1   : > { %v385_v10 = vpack.c.bf16 %v1751_v7, %v1751_v7  ;;  %v1247_v11 = vpop.f32.mrb[3].mxu0 }
  0xf2 LB: >> { %v1448_v15 = vld [vmem:[%s1982_s3] sm:$0xff]   ;;  %v1618_v16 = vmov 0.0   ;;  %v1449_v17 = vld [vmem:[%s1982_s3 + $0x8] sm:$0xff]   ;;  %vm1619_vm2 = vmmov 0   ;;  %s1168_s30 = sshll.u32 %s1598_s19, 3  ;;  %vm518_vm3 = vcmask 130048   ;;  %s1598_s19 = sphi %s1762_s19, %s389_s19   ;;  %v1594_v14 = vphi %v1760_v14, %v1991_v14   ;;  %v1590_v13 = vphi %v1758_v13, %v1990_v13   ;;  %v1586_v12 = vphi %v1756_v12, %v1989_v12  }
  0xf3   : >> { %1248 = vmatprep.subr.bf16.mxu0 %v1618_v16  ;;  %1256 = vmatprep.subr.bf16.mxu1 %v1618_v16  ;;  %s396_s8 = sshra.s32 %s1168_s30, 3  ;;  %v1450_v19 = vld [vmem:[%s1983_s4] sm:$0xff]   ;;  %v1451_v20 = vld [vmem:[%s1983_s4 + $0x8] sm:$0xff]   ;;  %v1802_v27 = vand.u32 127, %v319_v0  ;;  %v567_v28 = vstv %s1168_s30  ;;  %vm571_vm5 = vcmask 64512   ;;  %vm592_vm6 = vcmask 1043456  }
  0xf4   : >> { %1249 = vmatpush3.bf16.msra.mxu0 %v1448_v15  ;;  %1252 = vmatprep.mubr.msk.bf16.mxu0 %vm1619_vm2, %v1618_v16  ;;  %s1169_s10 = sshll.u32 %s396_s8, 2  ;;  %s389_s19 = sadd.s32 1, %s1598_s19  }
  0xf5   : >> { %1250 = vmatprep.subr.bf16.mxu0 %v1618_v16  ;;  %1260 = vmatprep.mubr.msk.bf16.mxu1 %vm1619_vm2, %v1618_v16  ;;  %s399_s12 = scalar_lea.vmem %s1745_s17, %s1169_s10  ;;  %v568_v29 = vadd.s32 %v567_v28, %v1802_v27  ;;  %p388_p12 = scmp.ge.s32.totalorder %s389_s19, 1 }
  0xf6   : >> { %v400_v18 = vld [vmem:[%s399_s12] sm:$0xf]  ;;  %1257 = vmatpush3.bf16.msra.mxu1 %v1450_v19  ;;  %v1456_v61 = vld [vmem:[%s1981_s2 + $0x10] sm:$0xff] (%p388_p12)   ;;  %v1457_v62 = vld [vmem:[%s1981_s2 + $0x18] sm:$0xff] (%p388_p12)   ;;  %v1843_v11 = vmov (%p388_p12), 0.0   ;;  %s1847_s19 = smov (%p388_p12), 0  }
  0xf7   : >> { %1258 = vmatprep.subr.bf16.mxu1 %v1618_v16  ;;  %vm569_vm4 = vcmp.gt.s32.totalorder %v568_v29, %v1729_v3 }
  0xf8   : >> { %1251 = vmatpush3.bf16.msra.mxu0 %v1449_v17 }
  0xf9   : >> { %1264 = vmatprep.subr.bf16.mxu0 %v1618_v16 }
  0xfa   : >> { %1259 = vmatpush3.bf16.msra.mxu1 %v1451_v20 }
  0xfb   : >> { %1253 = vmatmul.mubr.msk.bf16.vlgmr.msra.gmra.mrb[0].mxu0 %vm340_vm1, %v400_v18  ;;  %1270 = vmatprep.subr.bf16.mxu1 %v1618_v16 }
  0xfc   : >> { %1266 = vmatprep.mubr.msk.bf16.mxu0 %vm1619_vm2, %v1618_v16 }
  0xfd   : >> { %1261 = vmatmul.mubr.msk.bf16.vlgmr.msra.gmra.mrb[0].mxu1 %vm340_vm1, %v400_v18 }
  0xfe   : >> { %1272 = vmatprep.mubr.msk.bf16.mxu1 %vm1619_vm2, %v1618_v16 }
 0x1ce   : >> { %v454_v21 = vpop.f32.mrb[0].mxu0 }
 0x1cf   : >> { %v460_v22 = vpack.c.bf16 %v454_v21, %v454_v21  ;;  %v1254_v23 = vpop.f32.mrb[1].mxu0 }
 0x1d0   : >> { %v457_v24 = vpop.f32.mrb[2].mxu0  ;;  %v511_v36 = vpop.f32.mrb[0].mxu1 }
 0x1d1   : >> { %v523_v25 = vsel %vm518_vm3, %v460_v22, 0  ;;  %v1255_v26 = vpop.f32.mrb[3].mxu0  ;;  %v517_v37 = vpack.c.bf16 %v511_v36, %v511_v36  ;;  %v1262_v38 = vpop.f32.mrb[1].mxu1 }
 0x1d2   : >> { %1265 = vmatpush3.bf16.xpose.msra.mxu0 %v523_v25  ;;  %v514_v39 = vpop.f32.mrb[2].mxu1 }
 0x1d3   : >> { %v594_v40 = vsel %vm592_vm6, %v517_v37, 0  ;;  %v1263_v41 = vpop.f32.mrb[3].mxu1  ;;  %1276 = vmatprep.subr.bf16.mxu0 (%p388_p12), %v1616_v1 }
 0x1d4   : >> { %1271 = vmatpush3.bf16.msra.mxu1 %v594_v40 }
 0x1d9   : >> { %1267 = vmatmul.mubr.msk.bf16.vlgmr.msra.gmra.mrb[4].mxu0 %vm518_vm3, %v385_v10  ;;  %v1841_v10 = vmov (%p388_p12), 0.0  }
 0x1da   : > { %1280 = vmatprep.mubr.msk.bf16.mxu0 (%p388_p12), %vm1617_vm0, %v1616_v1  ;;  %1277 = vmatpush3.bf16.msra.mxu0 (%p388_p12), %v1456_v61 }
 0x1db   : > { %1278 = vmatprep.subr.bf16.mxu0 (%p388_p12), %v1616_v1 }
 0x1de   : > { %1279 = vmatpush3.bf16.msra.mxu0 (%p388_p12), %v1457_v62 }
 0x1e1   : > { %1281 = vmatmul.mubr.msk.bf16.vlgmr.msra.gmra.mrb[0].mxu0 (%p388_p12), %vm340_vm1, %v1747_v5 }
 0x2ac   : >> { %v559_v30 = vpop.f32.mrb[4].mxu0 }
 0x2ad   : >> { %v570_v31 = vsel %vm569_vm4, -3.4028235e+38, %v559_v30  ;;  %v1268_v32 = vpop.f32.mrb[5].mxu0 }
 0x2ae   : >> { %v562_v33 = vpop.f32.mrb[6].mxu0  ;;  %v572_v34 = vsel %vm571_vm5, %v570_v31, -inf }
 0x2af   : >> { %573 = vmax.xlane.f32.xlu0 %v572_v34  ;;  %v1269_v35 = vpop.f32.mrb[7].mxu0 }
 0x2b4   : > { %v690_v2 = vpop.f32.mrb[0].mxu0 (%p388_p12) }
 0x2b5   : > { %v1837_v4 = vmul.f32 (%p388_p12), 0.25, %v690_v2  ;;  %v1282_v6 = vpop.f32.mrb[1].mxu0 (%p388_p12) }
 0x2b6   : > { %v693_v7 = vpop.f32.mrb[2].mxu0 (%p388_p12) }
 0x2b7   : > { %v697_v8 = vpack.c.bf16 (%p388_p12), %v1837_v4, %v1837_v4  ;;  %v1283_v9 = vpop.f32.mrb[3].mxu0 (%p388_p12) }
 0x33c   : >> { %v574_v42 = vpop.xlane.xlu0 %573 }
 0x33d   : >> { %v575_v43 = vmax.f32 %v1594_v14, %v574_v42  }
 0x33f   : >> { %v576_v44 = vsub.f32 %v1594_v14, %v575_v43  ;;  %v579_v45 = vsub.f32 %v570_v31, %v575_v43  ;;  %v1991_v14 = vmov %v575_v43 }
 0x341   : >> { %v580_v46 = vmul.f32 1.442695, %v579_v45  ;;  %v577_v50 = vmul.f32 1.442695, %v576_v44 }
 0x343   : >> { %1452 = vpow2.f32 %v580_v46 }
 0x344   : >> { %1454 = vpow2.f32 %v577_v50 }
 0x34d   : >> { %v1453_v47 = vpop.eup %1452 }
 0x34e   : >> { %v583_v48 = vsel %vm571_vm5, %v1453_v47, 0.0  ;;  %v588_v49 = vpack.c.bf16 %v1453_v47, %v1453_v47  ;;  %v1455_v51 = vpop.eup %1454 }
 0x34f   : >> { %584 = vadd.xlane.f32.xlu0 %v583_v48  ;;  %v582_v52 = vmul.f32 %v1590_v13, %v1455_v51  ;;  %v587_v55 = vmul.f32 %v1586_v12, %v1455_v51 }
 0x350   : >> { %1273 = vmatmul.mubr.msk.bf16.vlgmr.msra.gmra.mrb[4].mxu1 %vm571_vm5, %v588_v49 }
 0x3dc   : >> { %v585_v53 = vpop.xlane.xlu0 %584 }
 0x3dd   : >> { %v586_v54 = vadd.f32 %v585_v53, %v582_v52  }
 0x3df   : >> { %v1990_v13 = vmov %v586_v54  ;;  %1458 = vrcp.f32 (%p388_p12), %v586_v54 }
 0x3e9   : > { %v1459_v63 = vpop.eup (%p388_p12), %1458 }
 0x420   : > { %391 = sbr.rel (!%p388_p12) target bundleno = 242 (0xf2), region = 105 }
 0x423   : >> { %v630_v56 = vpop.f32.mrb[4].mxu1 }
 0x424   : >> { %v636_v57 = vadd.f32 %v630_v56, %v587_v55   ;;  %v1274_v58 = vpop.f32.mrb[5].mxu1 }
 0x425   : >> { %v633_v59 = vpop.f32.mrb[6].mxu1 }
 0x426   : >> { %v1275_v60 = vpop.f32.mrb[7].mxu1  ;;  %v1989_v12 = vmov %v636_v57  ;;  %v1835_v0 = vmul.f32 (%p388_p12), %v1459_v63, %v636_v57 }
 0x427   : > { %v1845_v12 = vmov -3.4028235e+38  }
 0x428 LB: >> { %v1460_v5 = vld [vmem:[%s1982_s3 + $0x10] sm:$0xff]   ;;  %v1620_v13 = vmov 0.0   ;;  %v1461_v14 = vld [vmem:[%s1982_s3 + $0x18] sm:$0xff]   ;;  %vm1621_vm7 = vmmov 0   ;;  %s1185_s30 = sshll.u32 %s1614_s19, 3  ;;  %s701_s19 = sadd.s32 1, %s1614_s19   ;;  %s1614_s19 = sphi %s1847_s19, %s701_s19   ;;  %v1610_v12 = vphi %v1845_v12, %v1994_v12   ;;  %v1606_v11 = vphi %v1843_v11, %v1993_v11   ;;  %v1602_v10 = vphi %v1841_v10, %v1992_v10  }
 0x429   : >> { %1284 = vmatprep.subr.bf16.mxu0 %v1620_v13  ;;  %1292 = vmatprep.subr.bf16.mxu1 %v1620_v13  ;;  %s708_s8 = sshra.s32 %s1185_s30, 3  ;;  %v1462_v16 = vld [vmem:[%s1983_s4 + $0x10] sm:$0xff]   ;;  %v1463_v17 = vld [vmem:[%s1983_s4 + $0x18] sm:$0xff]   ;;  %v881_v24 = vstv %s1185_s30  ;;  %p700_p13 = scmp.ge.s32.totalorder %s701_s19, 1 }
 0x42a   : >> { %1285 = vmatpush3.bf16.msra.mxu0 %v1460_v5  ;;  %1288 = vmatprep.mubr.msk.bf16.mxu0 %vm1621_vm7, %v1620_v13  ;;  %s1186_s10 = sshll.u32 %s708_s8, 2  ;;  %v882_v25 = vadd.s32 %v881_v24, %v1802_v27  ;;  %v1468_v58 = vld [vmem:[%s1984_s5] sm:$0xff] (%p700_p13)   ;;  %v1469_v59 = vld [vmem:[%s1984_s5 + $0x8] sm:$0xff] (%p700_p13)   ;;  %s1208_s21 = sshll.u32 (%p700_p13), %s1574_s27, 7 }
 0x42b   : >> { %1286 = vmatprep.subr.bf16.mxu0 %v1620_v13  ;;  %1296 = vmatprep.mubr.msk.bf16.mxu1 %vm1621_vm7, %v1620_v13  ;;  %s711_s12 = scalar_lea.vmem %s1745_s17, %s1186_s10  ;;  %s1622_s17 = smov (%p700_p13), 16   ;;  %v1203_v63 = vld [vmem:[%s1985_s6] ss:$0 sm:$0xff] (%p700_p13) }
 0x42c   : >> { %v712_v15 = vld [vmem:[%s711_s12] sm:$0xf]  ;;  %1293 = vmatpush3.bf16.msra.mxu1 %v1462_v16  ;;  %vm883_vm8 = vcmp.gt.s32.totalorder %v882_v25, %v1729_v3  ;;  %s1042_s22 = sshll.u32 (%p700_p13), %s304_s18, 4  ;;  %s1927_s8 = scalar_lea.hbm (%p700_p13), %s1986_s7, %s1208_s21  ;;  %s1929_s22 = int_to_ptr.vmem [resolvable:$true] %s1042_s22 }
 0x42d   : >> { %1294 = vmatprep.subr.bf16.mxu1 %v1620_v13  ;;  %s1028_s27 = scalar_lea.sflag (%p700_p13), [#allocation3], %s302_s15  ;;  %s1472_s10 = scalar_lea.vmem (%p700_p13), %s1929_s22, 128 }
 0x42e   : >> { %1287 = vmatpush3.bf16.msra.mxu0 %v1461_v14  ;;  %p1473_p0 = scmp.ne.s32.totalorder (%p700_p13), %s1929_s22, %s1472_s10  ;;  %s1623_s12 = smov (%p700_p13), [#allocation2]  }
 0x42f   : >> { %1300 = vmatprep.subr.bf16.mxu0 %v1620_v13 }
 0x430   : >> { %1295 = vmatpush3.bf16.msra.mxu1 %v1463_v17  ;;  %p1474_p1 = pnand (%p700_p13), %p1473_p0, %p1704_p4 }
 0x431   : >> { %1289 = vmatmul.mubr.msk.bf16.vlgmr.msra.gmra.mrb[0].mxu0 %vm340_vm1, %v712_v15  ;;  %1306 = vmatprep.subr.bf16.mxu1 %v1620_v13 }
 0x432   : >> { %1302 = vmatprep.mubr.msk.bf16.mxu0 %vm1621_vm7, %v1620_v13  ;;  %p1475_p2 = pneg (%p700_p13), %p1474_p1 }
 0x433   : >> { %1297 = vmatmul.mubr.msk.bf16.vlgmr.msra.gmra.mrb[0].mxu1 %vm340_vm1, %v712_v15 }
 0x434   : >> { %1308 = vmatprep.mubr.msk.bf16.mxu1 %vm1621_vm7, %v1620_v13 }
 0x504   : >> { %v767_v18 = vpop.f32.mrb[0].mxu0 }
 0x505   : >> { %v773_v19 = vpack.c.bf16 %v767_v18, %v767_v18  ;;  %v1290_v20 = vpop.f32.mrb[1].mxu0 }
 0x506   : >> { %v770_v21 = vpop.f32.mrb[2].mxu0  ;;  %v825_v33 = vpop.f32.mrb[0].mxu1 }
 0x507   : >> { %v837_v22 = vsel %vm518_vm3, %v773_v19, 0  ;;  %v1291_v23 = vpop.f32.mrb[3].mxu0  ;;  %v831_v34 = vpack.c.bf16 %v825_v33, %v825_v33  ;;  %v1298_v35 = vpop.f32.mrb[1].mxu1 }
 0x508   : >> { %1301 = vmatpush3.bf16.xpose.msra.mxu0 %v837_v22  ;;  %v828_v36 = vpop.f32.mrb[2].mxu1 }
 0x509   : >> { %v908_v37 = vsel %vm592_vm6, %v831_v34, 0  ;;  %v1299_v38 = vpop.f32.mrb[3].mxu1  ;;  %1312 = vmatprep.subr.bf16.mxu0 (%p700_p13), %v1616_v1 }
 0x50a   : >> { %1307 = vmatpush3.bf16.msra.mxu1 %v908_v37 }
 0x50f   : >> { %1303 = vmatmul.mubr.msk.bf16.vlgmr.msra.gmra.mrb[4].mxu0 %vm518_vm3, %v697_v8 }
 0x510   : > { %1316 = vmatprep.mubr.msk.bf16.mxu0 (%p700_p13), %vm1617_vm0, %v1616_v1  ;;  %1313 = vmatpush3.bf16.msra.mxu0 (%p700_p13), %v1468_v58 }
 0x511   : > { %1314 = vmatprep.subr.bf16.mxu0 (%p700_p13), %v1616_v1 }
 0x514   : > { %1315 = vmatpush3.bf16.msra.mxu0 (%p700_p13), %v1469_v59 }
 0x5e2   : >> { %v873_v26 = vpop.f32.mrb[4].mxu0 }
 0x5e3   : >> { %v884_v28 = vsel %vm883_vm8, -3.4028235e+38, %v873_v26  ;;  %v1304_v29 = vpop.f32.mrb[5].mxu0 }
 0x5e4   : >> { %v876_v30 = vpop.f32.mrb[6].mxu0  ;;  %v886_v31 = vsel %vm571_vm5, %v884_v28, -inf }
 0x5e5   : >> { %887 = vmax.xlane.f32.xlu0 %v886_v31  ;;  %v1305_v32 = vpop.f32.mrb[7].mxu0 }
 0x672   : >> { %v888_v39 = vpop.xlane.xlu0 %887 }
 0x673   : >> { %v889_v40 = vmax.f32 %v1610_v12, %v888_v39  }
 0x675   : >> { %v890_v41 = vsub.f32 %v1610_v12, %v889_v40  ;;  %v893_v42 = vsub.f32 %v884_v28, %v889_v40  ;;  %v1994_v12 = vmov %v889_v40 }
 0x677   : >> { %v894_v43 = vmul.f32 1.442695, %v893_v42  ;;  %v891_v47 = vmul.f32 1.442695, %v890_v41 }
 0x679   : >> { %1464 = vpow2.f32 %v894_v43 }
 0x67a   : >> { %1466 = vpow2.f32 %v891_v47 }
 0x683   : >> { %v1465_v44 = vpop.eup %1464 }
 0x684   : >> { %v897_v45 = vsel %vm571_vm5, %v1465_v44, 0.0  ;;  %v902_v46 = vpack.c.bf16 %v1465_v44, %v1465_v44  ;;  %v1467_v48 = vpop.eup %1466 }
 0x685   : >> { %898 = vadd.xlane.f32.xlu0 %v897_v45  ;;  %v896_v49 = vmul.f32 %v1606_v11, %v1467_v48  ;;  %v901_v52 = vmul.f32 %v1602_v10, %v1467_v48 }
 0x686   : >> { %1309 = vmatmul.mubr.msk.bf16.vlgmr.msra.gmra.mrb[4].mxu1 %vm571_vm5, %v902_v46 }
 0x712   : >> { %v899_v50 = vpop.xlane.xlu0 %898 }
 0x713   : >> { %v900_v51 = vadd.f32 %v899_v50, %v896_v49  }
 0x715   : >> { %v1993_v11 = vmov %v900_v51  ;;  %1470 = vrcp.f32 (%p700_p13), %v900_v51 }
 0x71f   : > { %v1471_v3 = vpop.eup (%p700_p13), %1470 }
 0x756   : > { %703 = sbr.rel (!%p700_p13) target bundleno = 1064 (0x428), region = 116 }
 0x759   : >> { %v944_v53 = vpop.f32.mrb[4].mxu1 }
 0x75a   : >> { %v950_v54 = vadd.f32 %v944_v53, %v901_v52   ;;  %v1310_v55 = vpop.f32.mrb[5].mxu1 }
 0x75b   : >> { %v947_v56 = vpop.f32.mrb[6].mxu1 }
 0x75c   : >> { %v1311_v57 = vpop.f32.mrb[7].mxu1  ;;  %v1992_v10 = vmov %v950_v54  ;;  %v952_v27 = vmul.f32 (%p700_p13), %v1471_v3, %v950_v54 }
 0x75e   : > { %954 = vrot.lane.b32.xlu0 %v952_v27, %s1622_s17  ;;  %s1476_s17 = sshll.u32 %s1623_s12, 4  ;;  %s1477_s17 = int_to_ptr.vmem [resolvable:$false] %s1476_s17 }
 0x75f   : > { %s1478_s19 = scalar_lea.vmem %s1477_s17, 256  ;;  %p1479_p3 = scmp.lt.s32.totalorder %s1929_s22, %s1477_s17 }
 0x760   : > { %p1480_p5 = scmp.lt.s32.totalorder %s1478_s19, %s1472_s10 }
 0x762   : > { %p1481_p6 = por %p1480_p5, %p1479_p3 }
 0x764   : > { %p1482_p7 = pnand %p1481_p6, %p1475_p2 }
 0x7d0   : > { %v955_v60 = vpop.permute.xlu0 %954 }
 0x7d1   : > { %v958_v61 = vsel %vm518_vm3, %v1835_v0, %v955_v60 }
 0x7d2   : > { %v959_v62 = vpack.c.bf16 %v958_v61, %v958_v61 }
 0x7d4   : > { %1317 = vmatmul.mubr.msk.bf16.vlgmr.msra.gmra.mrb[0].mxu0 %vm340_vm1, %v959_v62 }
 0x8a7   : > { %v1020_v1 = vpop.f32.mrb[0].mxu0 }
 0x8a8   : > { %v1021_v2 = vadd.f32 %v1203_v63, %v1020_v1  ;;  %v1318_v4 = vpop.f32.mrb[1].mxu0 }
 0x8a9   : > { %v1023_v0 = vpop.f32.mrb[2].mxu0 }
 0x8aa   : > { %1026 = vst.msk [vmem:[%s304_s18] sm:$0xff] %vm340_vm1, %v1021_v2  ;;  %v1319_v6 = vpop.f32.mrb[3].mxu0 }
 0x8ab   : > { %1485 = shalt.err (!%p1482_p7)
}
 0x8ac   : > { %s1486_s15 = scalar_lea.hbm %s1927_s8, 128  ;;  %s1490_s20 = scalar_lea.hbm %s1986_s7, 256 }
 0x8ad   : > { %p1487_p9 = scmp.ne.s32.totalorder %s1927_s8, %s1486_s15  ;;  %p1491_p12 = scmp.lt.u32.totalorder %s1927_s8, %s1986_s7 }
 0x8ae   : > { %p1492_p13 = scmp.lt.u32.totalorder %s1490_s20, %s1486_s15  ;;  %p1494_p1 = scmp.lt.u32.totalorder %s1486_s15, %s1927_s8 }
 0x8af   : > { %p1488_p10 = pnand %p1487_p9, %p1704_p4 }
 0x8b0   : > { %p1493_p0 = por %p1492_p13, %p1491_p12 }
 0x8b1   : > { %p1489_p11 = pneg %p1488_p10 }
 0x8b2   : > { %p1495_p2 = por %p1494_p1, %p1493_p0 }
 0x8b4   : > { %p1496_p3 = pnand %p1495_p2, %p1489_p11 }
 0x8b6   : > { %1499 = shalt.err (!%p1496_p3)
}
 0x8b7   : > { %1320 = dma.vmem_to_hbm [thread:$0]  (%p1704_p4), %s1929_s22, 128, %s1927_s8, %s1028_s27  }
 0x8b8 PF: > { %p1326_p5 = scmp.ge.s32.totalorder %s1582_s29, 2  ;;  %s1054_s30 = sand.u32 1, %s1562_s24  }
 0x8b9   : > { %s1055_s10 = scalar_lea.sflag [#allocation3], %s1054_s30 }
 0x8ba   : > { %p1323_p6 = pnand %p1326_p5, %p1711_p8 }
 0x8bc   : > { %1557 = dma.done.wait (!%p1323_p6), %s1055_s10, 128  }
 0x8bd   : > { %1559 = vsyncadd (!%p1323_p6), %s1055_s10, 4294967168  ;;  %s20_s29 = sadd.s32 1, %s1582_s29   ;;  %s1995_s24 = smov %s1566_s25 }
 0x8be   : > { %p17_p7 = scmp.ge.s32.totalorder %s20_s29, 4   ;;  %s1996_s25 = smov %s1570_s26 }
 0x8bf   : > { %s1997_s26 = smov %s1717_s14  ;;  %s1998_s27 = smov %s1578_s28 }
 0x8c0   : > { %s1999_s28 = smov %s2001_s9  ;;  %19 = sbr.rel (!%p17_p7) target bundleno = 4 (0x4), region = 127 }
 0x8c7   :  { %1060 = vsyncpa [#allocation3], 1 }
 0x8c8   :  { %1062 = vsyncpa [#allocation3 + $0x1], 1 }

</bundles_post_ra>
